<compile_context>
chip_gen: v7x
topology: tpu7x:2x2x1
jax: 0.10.0
libtpu: 0.0.40
codegen_flags: <defaults>
</compile_context>

<pallas_src>
import functools

import jax
import jax.numpy as jnp
from jax.experimental import pallas as pl
from jax.experimental.pallas import tpu as pltpu


def _round_up(x, m):
    return (x + m - 1) // m * m


def _triplet_kernel(a_ref, p_ref, n_ref, o_ref, *, margin, eps, feat_dim):
    a = a_ref[...]
    # Subtract in the native dtype, accumulate in f32.
    d_ap = (a - p_ref[...]).astype(jnp.float32)
    d_an = (a - n_ref[...]).astype(jnp.float32)

    # torch.pairwise_distance adds eps to the difference before the norm.
    sq_ap = (d_ap + eps) * (d_ap + eps)
    sq_an = (d_an + eps) * (d_an + eps)

    if feat_dim != d_ap.shape[-1]:
        # Zero out contributions from zero-padded feature lanes (otherwise the
        # +eps term adds eps^2 per padded lane).
        lane = jax.lax.broadcasted_iota(jnp.int32, d_ap.shape, dimension=1)
        valid = lane < feat_dim
        sq_ap = jnp.where(valid, sq_ap, 0.0)
        sq_an = jnp.where(valid, sq_an, 0.0)

    dap = jnp.sqrt(jnp.sum(sq_ap, axis=-1, keepdims=True))  # (TILE_N, 1)
    dan = jnp.sqrt(jnp.sum(sq_an, axis=-1, keepdims=True))  # (TILE_N, 1)

    o_ref[...] = jnp.maximum(dap - dan + margin, 0.0)


def triplet_margin_loss(anchors, positives, negatives,
                        loss_weight=1.0, margin=1.0, eps=1e-6):
    """Pallas TPU implementation of mmdet TripletMarginLoss.forward."""
    assert anchors.shape == positives.shape == negatives.shape
    assert anchors.ndim == 2, "expected (N, D) embeddings"
    N, D = anchors.shape
    itemsize = jnp.dtype(anchors.dtype).itemsize

    # Lane-dense feature dim.
    D_pad = _round_up(D, 128)
    # Sublane granularity by dtype width (f32: 8, bf16: 16, int8/fp8: 32).
    sublane = {4: 8, 2: 16, 1: 32}.get(itemsize, 8)

    # Cap the tile so 3 inputs x 2 pipeline buffers stay within ~8 MiB of
    # VMEM — safe under the default scoped limit on v5e/v6e/v7x, so the
    # pipeline keeps double-buffering on every generation.
    budget_bytes = 8 * 1024 * 1024
    max_rows = max(sublane, budget_bytes // (3 * 2 * D_pad * itemsize))
    tile_n = min(512, max_rows, _round_up(N, sublane))
    tile_n = max(sublane, (tile_n // sublane) * sublane)

    N_pad = _round_up(N, tile_n)
    num_tiles = N_pad // tile_n

    def _pad(x):
        if x.shape == (N_pad, D_pad):
            return x
        return jnp.pad(x, ((0, N_pad - N), (0, D_pad - D)))

    a_p, p_p, n_p = _pad(anchors), _pad(positives), _pad(negatives)

    kernel = functools.partial(
        _triplet_kernel, margin=margin, eps=eps, feat_dim=D)

    in_spec = pl.BlockSpec((tile_n, D_pad), lambda i: (i, 0))
    out_spec = pl.BlockSpec((tile_n, 1), lambda i: (i, 0))

    per_sample = pl.pallas_call(
        kernel,
        out_shape=jax.ShapeDtypeStruct((N_pad, 1), jnp.float32),
        grid_spec=pltpu.PrefetchScalarGridSpec(
            num_scalar_prefetch=0,
            grid=(num_tiles,),
            in_specs=[in_spec, in_spec, in_spec],
            out_specs=out_spec,
        ),
        compiler_params=pltpu.CompilerParams(
            dimension_semantics=("parallel",)),
    )(a_p, p_p, n_p)

    # Drop padded batch rows, finalize mean + loss_weight once (exact N).
    return loss_weight * jnp.sum(per_sample[:N, 0]) / N


def _reference(anchors, positives, negatives, loss_weight=1.0, margin=1.0,
               eps=1e-6):
    a = anchors.astype(jnp.float32)
    p = positives.astype(jnp.float32)
    n = negatives.astype(jnp.float32)
    dap = jnp.sqrt(jnp.sum((a - p + eps) ** 2, axis=-1))
    dan = jnp.sqrt(jnp.sum((a - n + eps) ** 2, axis=-1))
    return loss_weight * jnp.mean(jnp.maximum(dap - dan + margin, 0.0))


if __name__ == "__main__":
    key = jax.random.PRNGKey(0)

    # Case 1: small, "nice" shapes (batch=8 triplets, embedding dim=32).
    k1, k2, k3, k4, k5, k6 = jax.random.split(key, 6)
    N, D = 8, 32
    anchors = jax.random.normal(k1, (N, D), dtype=jnp.float32)
    positives = jax.random.normal(k2, (N, D), dtype=jnp.float32)
    negatives = jax.random.normal(k3, (N, D), dtype=jnp.float32)

    loss = triplet_margin_loss(anchors, positives, negatives, loss_weight=1.0)
    loss = jax.block_until_ready(loss)
    ref = _reference(anchors, positives, negatives, loss_weight=1.0)
    assert jnp.allclose(loss, ref, rtol=1e-5, atol=1e-5), (loss, ref)

    # Case 2: ragged shapes (exercise batch + feature padding paths).
    N2, D2 = 13, 40
    a2 = jax.random.normal(k4, (N2, D2), dtype=jnp.float32)
    p2 = jax.random.normal(k5, (N2, D2), dtype=jnp.float32)
    n2 = jax.random.normal(k6, (N2, D2), dtype=jnp.float32)

    loss2 = triplet_margin_loss(a2, p2, n2, loss_weight=0.5)
    loss2 = jax.block_until_ready(loss2)
    ref2 = _reference(a2, p2, n2, loss_weight=0.5)
    assert jnp.allclose(loss2, ref2, rtol=1e-5, atol=1e-5), (loss2, ref2)

    print("KERNEL_OK")
</pallas_src>

<mosaic_0001>
module attributes {stable_mosaic.version = 11 : i64} {
  func.func @_triplet_kernel(%arg0: i32, %arg1: memref<8x128xf32, #tpu.memory_space<vmem>>, %arg2: memref<8x128xf32, #tpu.memory_space<vmem>>, %arg3: memref<8x128xf32, #tpu.memory_space<vmem>>, %arg4: memref<8x1xf32, #tpu.memory_space<vmem>>) attributes {dimension_semantics = [#tpu.dimension_semantics<parallel>], iteration_bounds = array<i64: 1>, scalar_prefetch = 0 : i64, scratch_operands = 0 : i64, tpu.core_type = #tpu.core_type<tc>, window_params = [{transform_indices = @transform_0, window_bounds = array<i64: 8, 128>}, {transform_indices = @transform_1, window_bounds = array<i64: 8, 128>}, {transform_indices = @transform_2, window_bounds = array<i64: 8, 128>}, {transform_indices = @transform_3, window_bounds = array<i64: 8, 1>}]} {
    %c0 = arith.constant 0 : index
    %c0_0 = arith.constant 0 : index
    %0 = vector.load %arg1[%c0, %c0_0] : memref<8x128xf32, #tpu.memory_space<vmem>>, vector<8x128xf32>
    %c0_1 = arith.constant 0 : index
    %c0_2 = arith.constant 0 : index
    %1 = vector.load %arg2[%c0_1, %c0_2] : memref<8x128xf32, #tpu.memory_space<vmem>>, vector<8x128xf32>
    %2 = arith.subf %0, %1 : vector<8x128xf32>
    %c0_3 = arith.constant 0 : index
    %c0_4 = arith.constant 0 : index
    %3 = vector.load %arg3[%c0_3, %c0_4] : memref<8x128xf32, #tpu.memory_space<vmem>>, vector<8x128xf32>
    %4 = arith.subf %0, %3 : vector<8x128xf32>
    %cst = arith.constant 9.99999997E-7 : f32
    %5 = vector.broadcast %cst : f32 to vector<8x128xf32>
    %6 = arith.addf %2, %5 : vector<8x128xf32>
    %cst_5 = arith.constant 9.99999997E-7 : f32
    %7 = vector.broadcast %cst_5 : f32 to vector<8x128xf32>
    %8 = arith.addf %2, %7 : vector<8x128xf32>
    %9 = arith.mulf %6, %8 : vector<8x128xf32>
    %cst_6 = arith.constant 9.99999997E-7 : f32
    %10 = vector.broadcast %cst_6 : f32 to vector<8x128xf32>
    %11 = arith.addf %4, %10 : vector<8x128xf32>
    %cst_7 = arith.constant 9.99999997E-7 : f32
    %12 = vector.broadcast %cst_7 : f32 to vector<8x128xf32>
    %13 = arith.addf %4, %12 : vector<8x128xf32>
    %14 = arith.mulf %11, %13 : vector<8x128xf32>
    %15 = tpu.iota {dimensions = array<i32: 1>} : vector<8x128xi32>
    %c32_i32 = arith.constant 32 : i32
    %16 = vector.broadcast %c32_i32 : i32 to vector<8x128xi32>
    %17 = arith.cmpi slt, %15, %16 : vector<8x128xi32>
    %cst_8 = arith.constant 0.000000e+00 : f32
    %18 = vector.broadcast %cst_8 : f32 to vector<8x128xf32>
    %19 = arith.select %17, %9, %18 : vector<8x128xi1>, vector<8x128xf32>
    %cst_9 = arith.constant 0.000000e+00 : f32
    %20 = vector.broadcast %cst_9 : f32 to vector<8x128xf32>
    %21 = arith.select %17, %14, %20 : vector<8x128xi1>, vector<8x128xf32>
    %cst_10 = arith.constant dense<0.000000e+00> : vector<8xf32>
    %22 = vector.multi_reduction <add>, %19, %cst_10 [1] : vector<8x128xf32> to vector<8xf32>
    %23 = vector.shape_cast %22 : vector<8xf32> to vector<8x1xf32>
    %24 = math.sqrt %23 : vector<8x1xf32>
    %cst_11 = arith.constant dense<0.000000e+00> : vector<8xf32>
    %25 = vector.multi_reduction <add>, %21, %cst_11 [1] : vector<8x128xf32> to vector<8xf32>
    %26 = vector.shape_cast %25 : vector<8xf32> to vector<8x1xf32>
    %27 = math.sqrt %26 : vector<8x1xf32>
    %28 = arith.subf %24, %27 : vector<8x1xf32>
    %cst_12 = arith.constant 1.000000e+00 : f32
    %29 = vector.broadcast %cst_12 : f32 to vector<8x1xf32>
    %30 = arith.addf %28, %29 : vector<8x1xf32>
    %cst_13 = arith.constant 0.000000e+00 : f32
    %31 = vector.broadcast %cst_13 : f32 to vector<8x1xf32>
    %32 = arith.maximumf %30, %31 : vector<8x1xf32>
    %c0_14 = arith.constant 0 : index
    %c0_15 = arith.constant 0 : index
    %33 = vector.load %arg4[%c0_14, %c0_15] : memref<8x1xf32, #tpu.memory_space<vmem>>, vector<8x1xf32>
    tpu.vector_store %arg4[%c0_14, %c0_15], %32 {strides = array<i32>} : memref<8x1xf32, #tpu.memory_space<vmem>>, vector<8x1xf32>,
    return
  }
  func.func @transform_0(%arg0: i32) -> (i32, i32) {
    %c0_i32 = arith.constant 0 : i32
    %c0_i32_0 = arith.constant 0 : i32
    return %arg0, %c0_i32 : i32, i32
  }
  func.func @transform_1(%arg0: i32) -> (i32, i32) {
    %c0_i32 = arith.constant 0 : i32
    %c0_i32_0 = arith.constant 0 : i32
    return %arg0, %c0_i32 : i32, i32
  }
  func.func @transform_2(%arg0: i32) -> (i32, i32) {
    %c0_i32 = arith.constant 0 : i32
    %c0_i32_0 = arith.constant 0 : i32
    return %arg0, %c0_i32 : i32, i32
  }
  func.func @transform_3(%arg0: i32) -> (i32, i32) {
    %c0_i32 = arith.constant 0 : i32
    %c0_i32_0 = arith.constant 0 : i32
    return %arg0, %c0_i32 : i32, i32
  }
}

</mosaic_0001>

<bundles_post_ra>
// kernel: tpu_custom_call.1
= control target key start
LH: loop header
LB: loop body
LE: loop exit
PB: predicated region body
PF: predicated region fallthrough
CT: control target
= control target key end

     0   :  { %8 = vsyncpa [#allocation3], 0  ;;  %s231_s0 = inlined_call_operand.hbm [shape: f32[8,128], index: 0, kind: input, shape index: {}]   ;;  %s232_s1 = inlined_call_operand.hbm [shape: f32[8,128], index: 1, kind: input, shape index: {}]   ;;  %s233_s2 = inlined_call_operand.hbm [shape: f32[8,128], index: 2, kind: input, shape index: {}]   ;;  %s234_s3 = inlined_call_operand.vmem [shape: f32[8,1], index: 3, kind: output, shape index: {}]  }
   0x1   :  { %9 = vsyncpa [#allocation5], 0  ;;  %s169_s12 = smov [#allocation4]   ;;  %s170_s14 = smov [#allocation2]  }
   0x2   :  { %s26_s13 = sshll.u32 %s169_s12, 4  ;;  %s16_s15 = sshll.u32 %s170_s14, 4  ;;  %s27_s13 = int_to_ptr.vmem [resolvable:$true] %s26_s13  ;;  %s17_s15 = int_to_ptr.vmem [resolvable:$true] %s16_s15 }
   0x3   :  { %s99_s18 = scalar_lea.hbm %s232_s1, 128 }
   0x4   :  { %p100_p0 = scmp.ne.s32.totalorder %s232_s1, %s99_s18  ;;  %p103_p1 = scmp.lt.u32.totalorder %s99_s18, %s232_s1 }
   0x6   :  { %p105_p2 = pnand %p103_p1, %p100_p0 }
   0x8   :  { %108 = shalt.err (!%p105_p2)
}
   0x9   :  { %s109_s23 = scalar_lea.vmem %s27_s13, 128  ;;  %p114_p4 = scmp.lt.s32.totalorder %s27_s13, %s27_s13 }
   0xa   :  { %p110_p3 = scmp.ne.s32.totalorder %s27_s13, %s109_s23  ;;  %p115_p5 = scmp.lt.s32.totalorder %s109_s23, %s109_s23 }
   0xc   :  { %p116_p6 = por %p115_p5, %p114_p4 }
   0xe   :  { %p117_p7 = pnand %p116_p6, %p110_p3 }
  0x10   :  { %120 = shalt.err (!%p117_p7)
}
  0x11   :  { %29 = dma.hbm_to_vmem [thread:$0]  %s232_s1, 128, %s27_s13, [#allocation5]  }
  0x12   :  { %s121_s28 = scalar_lea.hbm %s231_s0, 128 }
  0x13   :  { %p122_p8 = scmp.ne.s32.totalorder %s231_s0, %s121_s28  ;;  %p125_p9 = scmp.lt.u32.totalorder %s121_s28, %s231_s0 }
  0x15   :  { %p127_p10 = pnand %p125_p9, %p122_p8 }
  0x17   :  { %130 = shalt.err (!%p127_p10)
}
  0x18   :  { %s131_s6 = scalar_lea.vmem %s17_s15, 128  ;;  %p136_p12 = scmp.lt.s32.totalorder %s17_s15, %s17_s15 }
  0x19   :  { %p132_p11 = scmp.ne.s32.totalorder %s17_s15, %s131_s6  ;;  %p137_p13 = scmp.lt.s32.totalorder %s131_s6, %s131_s6 }
  0x1b   :  { %p138_p0 = por %p137_p13, %p136_p12 }
  0x1d   :  { %p139_p1 = pnand %p138_p0, %p132_p11 }
  0x1f   :  { %142 = shalt.err (!%p139_p1)
}
  0x20   :  { %19 = dma.hbm_to_vmem [thread:$0]  %s231_s0, 128, %s17_s15, [#allocation3]  }
  0x21   :  { %s171_s8 = smov [#allocation6]   ;;  %s143_s12 = scalar_lea.hbm %s233_s2, 128 }
  0x22   :  { %s36_s9 = sshll.u32 %s171_s8, 4  ;;  %p144_p2 = scmp.ne.s32.totalorder %s233_s2, %s143_s12  ;;  %s37_s9 = int_to_ptr.vmem [resolvable:$true] %s36_s9 }
  0x23   :  { %p147_p3 = scmp.lt.u32.totalorder %s143_s12, %s233_s2 }
  0x25   :  { %p149_p4 = pnand %p147_p3, %p144_p2 }
  0x27   :  { %152 = shalt.err (!%p149_p4)
}
  0x28   :  { %s153_s18 = scalar_lea.vmem %s37_s9, 128  ;;  %p158_p6 = scmp.lt.s32.totalorder %s37_s9, %s37_s9 }
  0x29   :  { %p154_p5 = scmp.ne.s32.totalorder %s37_s9, %s153_s18  ;;  %p159_p7 = scmp.lt.s32.totalorder %s153_s18, %s153_s18 }
  0x2b   :  { %p160_p8 = por %p159_p7, %p158_p6 }
  0x2d   :  { %p161_p9 = pnand %p160_p8, %p154_p5 }
  0x2f   :  { %164 = shalt.err (!%p161_p9)
}
  0x30   :  { %39 = dma.hbm_to_vmem [thread:$0]  %s233_s2, 128, %s37_s9, [#allocation5]  }
  0x31   :  { %165 = dma.done.wait [#allocation3], 128  }
  0x32   :  { %166 = vsyncadd [#allocation3], 4294967168 }
  0x33   :  { %167 = dma.done.wait [#allocation5], 256  }
  0x34   :  { %168 = vsyncadd [#allocation5], 4294967040  ;;  %v58_v0 = vlaneseq  ;;  %v49_v1 = vld [vmem:[#allocation2] sm:$0xff]  ;;  %v50_v2 = vld [vmem:[#allocation4] sm:$0xff]  ;;  %vm84_vm5 = vcmask 7168  }
  0x35   :  { %v52_v4 = vld [vmem:[#allocation6] sm:$0xff]  ;;  %v51_v5 = vsub.f32 %v49_v1, %v50_v2 }
  0x36   :  { %v59_v3 = vand.u32 127, %v58_v0  ;;  %v53_v6 = vsub.f32 %v49_v1, %v52_v4 }
  0x37   :  { %v54_v7 = vadd.f32 1e-06, %v51_v5 }
  0x38   :  { %v56_v8 = vadd.f32 1e-06, %v53_v6  ;;  %vm60_vm0 = vcmp.lt.s32.totalorder %v59_v3, 32 }
  0x39   :  { %v55_v9 = vmul.f32 %v54_v7, %v54_v7 }
  0x3a   :  { %v57_v10 = vmul.f32 %v56_v8, %v56_v8 }
  0x3b   :  { %v61_v11 = vsel %vm60_vm0, %v55_v9, 0.0 }
  0x3c   :  { %63 = vadd.xlane.f32.xlu0 %v61_v11  ;;  %v62_v12 = vsel %vm60_vm0, %v57_v10, 0.0 }
  0x40   :  { %72 = vadd.xlane.f32.xlu0 %v62_v12 }
  0xc9   :  { %v64_v13 = vpop.xlane.xlu0 %63 }
  0xca   :  { %95 = vrsqrt.f32 %v64_v13  ;;  %vm67_vm1 = vcmp.eq.f32.partialorder %v64_v13, inf  ;;  %v70_v20 = vand.u32 2147483648, %v64_v13  ;;  %vm69_vm3 = vcmp.eq.f32.partialorder %v64_v13, 0.0 }
  0xcd   :  { %v73_v14 = vpop.xlane.xlu0 %72 }
  0xce   :  { %97 = vrsqrt.f32 %v73_v14  ;;  %vm76_vm2 = vcmp.eq.f32.partialorder %v73_v14, inf  ;;  %v79_v21 = vand.u32 2147483648, %v73_v14  ;;  %vm78_vm4 = vcmp.eq.f32.partialorder %v73_v14, 0.0 }
  0xd4   :  { %v96_v15 = vpop.eup %95 }
  0xd5   :  { %v66_v16 = vmul.f32 %v96_v15, %v64_v13 }
  0xd7   :  { %v68_v18 = vsel %vm67_vm1, %v64_v13, %v66_v16 }
  0xd8   :  { %v98_v17 = vpop.eup %97  ;;  %v71_v23 = vsel %vm69_vm3, %v70_v20, %v68_v18 }
  0xd9   :  { %v75_v19 = vmul.f32 %v98_v17, %v73_v14 }
  0xdb   :  { %v77_v22 = vsel %vm76_vm2, %v73_v14, %v75_v19 }
  0xdc   :  { %v80_v24 = vsel %vm78_vm4, %v79_v21, %v77_v22 }
  0xdd   :  { %v81_v25 = vsub.f32 %v71_v23, %v80_v24 }
  0xdf   :  { %v82_v26 = vadd.f32 1.0, %v81_v25 }
  0xe1   :  { %v83_v27 = vmax.f32 %v82_v26, 0.0 }
  0xe3   :  { %85 = vst.msk [vmem:[%s234_s3] sm:$0xff] %vm84_vm5, %v83_v27 }
  0xe4   :  { %90 = vsyncpa [#allocation3], 1 }
  0xe5   :  { %91 = vsyncpa [#allocation5], 1 }

</bundles_post_ra>
